<compile_context>
chip_gen: v6e
topology: v6e:2x2x1
jax: 0.10.0
libtpu: 0.0.40
codegen_flags: <defaults>
</compile_context>

<pallas_src>
import jax
import jax.numpy as jnp
from jax.experimental import pallas as pl
from jax.experimental.pallas import tpu as pltpu

NUM_OUTPUTS = 6
OUT_WIDTH = 8          # stored head width (6 real outputs, padded to 8)
_EPS = 1e-5


def _round_up(x, m):
    return ((x + m - 1) // m) * m


# ----------------------------------------------------------------------------
# Kernel
# ----------------------------------------------------------------------------
def _mlp_kernel(x_ref,
                w1_ref, t1_ref,
                w2_ref, t2_ref,
                w3_ref, t3_ref,
                w4_ref, b4_ref,
                o_ref):
    # Cast f32 input tile -> bf16 in-kernel (saves a wrapper-side HBM pass).
    x = x_ref[...].astype(w1_ref.dtype)

    # Layer 1: Linear(input, 256) with BN1 folded into w1; shift + ReLU in f32.
    h = jnp.dot(x, w1_ref[...], preferred_element_type=jnp.float32)
    h = jnp.maximum(h + t1_ref[...], 0.0).astype(w2_ref.dtype)
    # Dropout(0.3) in eval mode == identity

    # Layer 2: Linear(256, 128) + folded BN2 + ReLU
    h = jnp.dot(h, w2_ref[...], preferred_element_type=jnp.float32)
    h = jnp.maximum(h + t2_ref[...], 0.0).astype(w3_ref.dtype)

    # Layer 3: Linear(128, 64) + folded BN3 + ReLU (no lane padding of 64)
    h = jnp.dot(h, w3_ref[...], preferred_element_type=jnp.float32)
    h = jnp.maximum(h + t3_ref[...], 0.0).astype(w4_ref.dtype)

    # Output head: Linear(64, 6) stored as 8 lanes (narrow masked store is fine;
    # this kernel is bound by HBM traffic / step overhead, not the store slot).
    o_ref[...] = (jnp.dot(h, w4_ref[...], preferred_element_type=jnp.float32)
                  + b4_ref[...])


# ----------------------------------------------------------------------------
# Wrapper
# ----------------------------------------------------------------------------
def multi_output_crime_model(x, params, *, batch_tile=2048):
    """x: (B, input_size) float32. Returns (B, 6) float32."""
    (w1, t1, w2, t2, w3, t3, w4, b4) = params
    B, F = x.shape
    assert w1.shape[0] == F, "input feature dim mismatch"
    out_w = w4.shape[1]  # OUT_WIDTH (8)

    # Batch tile: 8-aligned, no larger than the (padded) batch.
    tile = max(8, min(batch_tile, _round_up(B, 8)))
    tile = _round_up(tile, 8)
    b_pad = _round_up(B, tile)

    # Only pad rows when needed (padded rows are row-isolated matmul+ReLU work
    # and are sliced away below, so their values are irrelevant).
    xq = x if b_pad == B else jnp.pad(x, ((0, b_pad - B), (0, 0)))

    # VMEM budget: double-buffered x/out tiles + f32 intermediates + weights,
    # clamped to stay safe on v5e (16 MiB scoped default) and v7x (64 MiB/TC).
    est = (2 * tile * F * 4                      # x tiles (f32, double-buffered)
           + 2 * tile * out_w * 4                # out tiles
           + 2 * tile * (256 + 128 + 64) * 4     # f32 intermediates (+ headroom)
           + (2 << 20))                          # weights / misc
    vmem_limit = min(max(est, 16 << 20), 40 << 20)

    def rep_spec(shape):
        # Replicated (non-tiled) parameter block; constant block index so the
        # pipeline does not re-DMA it every grid step.
        return pl.BlockSpec(shape, lambda i: tuple(0 for _ in shape))

    out = pl.pallas_call(
        _mlp_kernel,
        out_shape=jax.ShapeDtypeStruct((b_pad, out_w), jnp.float32),
        grid_spec=pltpu.PrefetchScalarGridSpec(
            num_scalar_prefetch=0,
            grid=(b_pad // tile,),
            in_specs=[
                pl.BlockSpec((tile, F), lambda i: (i, 0)),   # x tile (f32)
                rep_spec(w1.shape), rep_spec(t1.shape),
                rep_spec(w2.shape), rep_spec(t2.shape),
                rep_spec(w3.shape), rep_spec(t3.shape),
                rep_spec(w4.shape), rep_spec(b4.shape),
            ],
            out_specs=pl.BlockSpec((tile, out_w), lambda i: (i, 0)),
        ),
        compiler_params=pltpu.CompilerParams(
            dimension_semantics=("parallel",),
            vmem_limit_bytes=vmem_limit),
    )(xq, w1, t1, w2, t2, w3, t3, w4, b4)

    return out[:B, :NUM_OUTPUTS]


# ----------------------------------------------------------------------------
# Parameters
# ----------------------------------------------------------------------------
def init_raw_params(key, input_size):
    """Deterministic init with the same parameter shapes as the PyTorch module."""
    keys = jax.random.split(key, 16)
    ki = iter(range(16))

    def lin(din, dout):
        w = jax.random.normal(keys[next(ki)], (din, dout), jnp.float32) * 0.02
        b = jax.random.normal(keys[next(ki)], (dout,), jnp.float32) * 0.02
        return w, b

    def bn(n):
        gamma = 1.0 + 0.01 * jax.random.normal(keys[next(ki)], (n,), jnp.float32)
        beta = 0.01 * jax.random.normal(keys[next(ki)], (n,), jnp.float32)
        mean = jnp.zeros((n,), jnp.float32)   # running stats (eval mode)
        var = jnp.ones((n,), jnp.float32)
        return gamma, beta, mean, var

    dims = [(input_size, 256), (256, 128), (128, 64)]
    raw = {}
    for idx, (din, dout) in enumerate(dims):
        raw[f"fc{idx + 1}"] = lin(din, dout)
        raw[f"bn{idx + 1}"] = bn(dout)
    raw["out"] = lin(64, NUM_OUTPUTS)
    return raw


def prepare_params(raw, matmul_dtype=jnp.bfloat16):
    """Fold BN into weights, pad the 6-wide head to OUT_WIDTH, cast matmul operands.

    BatchNorm1d (eval):  y = gamma*(z - mean)/sqrt(var+eps) + beta,  z = x@w + b
      => y = x @ (w * scale) + (scale*(b - mean) + beta),  scale = gamma/sqrt(var+eps)
    """
    def fold(fc, bn):
        w, b = fc
        gamma, beta, mean, var = bn
        scale = gamma / jnp.sqrt(var + _EPS)
        return w * scale[None, :], scale * (b - mean) + beta

    w1, t1 = fold(raw["fc1"], raw["bn1"])
    w2, t2 = fold(raw["fc2"], raw["bn2"])
    w3, t3 = fold(raw["fc3"], raw["bn3"])
    w4, b4 = raw["out"]

    # Head padded only 6 -> 8 lanes (no 128-lane padding; no hidden3 padding).
    w4 = jnp.pad(w4, ((0, 0), (0, OUT_WIDTH - w4.shape[1])))
    b4 = jnp.pad(b4, ((0, OUT_WIDTH - b4.shape[0]),))

    def prep_w(w):
        return w.astype(matmul_dtype)

    def prep_t(t):
        return t.reshape(1, -1).astype(jnp.float32)  # added to the f32 accumulator

    return (prep_w(w1), prep_t(t1),
            prep_w(w2), prep_t(t2),
            prep_w(w3), prep_t(t3),
            prep_w(w4), prep_t(b4))


# ----------------------------------------------------------------------------
# References
# ----------------------------------------------------------------------------
def reference_forward(x, params):
    """Plain-JAX reference matching the kernel's quantized math."""
    (w1, t1, w2, t2, w3, t3, w4, b4) = params
    h = x.astype(w1.dtype)
    h = jnp.maximum(jnp.dot(h, w1, preferred_element_type=jnp.float32) + t1, 0.0)
    h = jnp.maximum(jnp.dot(h.astype(w2.dtype), w2,
                            preferred_element_type=jnp.float32) + t2, 0.0)
    h = jnp.maximum(jnp.dot(h.astype(w3.dtype), w3,
                            preferred_element_type=jnp.float32) + t3, 0.0)
    out = jnp.dot(h.astype(w4.dtype), w4,
                  preferred_element_type=jnp.float32) + b4
    return out[:, :NUM_OUTPUTS]


def reference_forward_f32(x, raw):
    """Unfolded f32 reference matching the PyTorch eval-mode forward."""
    h = x
    for idx in range(3):
        w, b = raw[f"fc{idx + 1}"]
        gamma, beta, mean, var = raw[f"bn{idx + 1}"]
        z = h @ w + b
        z = gamma * (z - mean) / jnp.sqrt(var + _EPS) + beta
        h = jnp.maximum(z, 0.0)   # dropout eval = identity
    w4, b4 = raw["out"]
    return h @ w4 + b4


# ----------------------------------------------------------------------------
# Self-test
# ----------------------------------------------------------------------------
if __name__ == "__main__":
    key = jax.random.PRNGKey(0)
    k_x, k_p = jax.random.split(key)

    batch = 100          # not a multiple of the tile -> exercises batch padding
    input_size = 32      # stands in for X.shape[1] of the CSV
    x = jax.random.normal(k_x, (batch, input_size), jnp.float32)

    raw = init_raw_params(k_p, input_size)
    params = prepare_params(raw)

    # batch_tile=64 here gives a 2-step grid on this small test; in production
    # use the default (2048) or sweep 2048-8192 (v7x: keep >=2 grid steps).
    out = multi_output_crime_model(x, params, batch_tile=64)
    out = jax.block_until_ready(out)
    assert out.shape == (batch, NUM_OUTPUTS)

    # Exact-math check against the identically quantized JAX reference.
    ref = reference_forward(x, params)
    assert jnp.allclose(out, ref, atol=2e-3, rtol=2e-2), "mismatch vs bf16 reference"

    # Sanity check against the unfolded f32 PyTorch-semantics reference
    # (looser tolerance for the bf16 matmul operands).
    ref32 = reference_forward_f32(x, raw)
    assert jnp.allclose(out, ref32, atol=5e-2, rtol=5e-2), "mismatch vs f32 reference"

    print("KERNEL_OK")
</pallas_src>

<mosaic_0001>
module attributes {stable_mosaic.version = 11 : i64} {
  func.func @_mlp_kernel(%arg0: i32, %arg1: memref<64x32xf32, #tpu.memory_space<vmem>>, %arg2: memref<32x256xbf16, #tpu.memory_space<vmem>>, %arg3: memref<1x256xf32, #tpu.memory_space<vmem>>, %arg4: memref<256x128xbf16, #tpu.memory_space<vmem>>, %arg5: memref<1x128xf32, #tpu.memory_space<vmem>>, %arg6: memref<128x64xbf16, #tpu.memory_space<vmem>>, %arg7: memref<1x64xf32, #tpu.memory_space<vmem>>, %arg8: memref<64x8xbf16, #tpu.memory_space<vmem>>, %arg9: memref<1x8xf32, #tpu.memory_space<vmem>>, %arg10: memref<64x8xf32, #tpu.memory_space<vmem>>) attributes {dimension_semantics = [#tpu.dimension_semantics<parallel>], iteration_bounds = array<i64: 2>, scalar_prefetch = 0 : i64, scratch_operands = 0 : i64, tpu.core_type = #tpu.core_type<tc>, window_params = [{transform_indices = @transform_0, window_bounds = array<i64: 64, 32>}, {pipeline_mode = #tpu.pipeline_mode<synchronous>, transform_indices = @transform_1, window_bounds = array<i64: 32, 256>}, {pipeline_mode = #tpu.pipeline_mode<synchronous>, transform_indices = @transform_2, window_bounds = array<i64: 1, 256>}, {pipeline_mode = #tpu.pipeline_mode<synchronous>, transform_indices = @transform_3, window_bounds = array<i64: 256, 128>}, {pipeline_mode = #tpu.pipeline_mode<synchronous>, transform_indices = @transform_4, window_bounds = array<i64: 1, 128>}, {pipeline_mode = #tpu.pipeline_mode<synchronous>, transform_indices = @transform_5, window_bounds = array<i64: 128, 64>}, {pipeline_mode = #tpu.pipeline_mode<synchronous>, transform_indices = @transform_6, window_bounds = array<i64: 1, 64>}, {pipeline_mode = #tpu.pipeline_mode<synchronous>, transform_indices = @transform_7, window_bounds = array<i64: 64, 8>}, {pipeline_mode = #tpu.pipeline_mode<synchronous>, transform_indices = @transform_8, window_bounds = array<i64: 1, 8>}, {transform_indices = @transform_9, window_bounds = array<i64: 64, 8>}]} {
    %c0 = arith.constant 0 : index
    %c0_0 = arith.constant 0 : index
    %0 = vector.load %arg1[%c0, %c0_0] : memref<64x32xf32, #tpu.memory_space<vmem>>, vector<64x32xf32>
    %1 = arith.truncf %0 : vector<64x32xf32> to vector<64x32xbf16>
    %c0_1 = arith.constant 0 : index
    %c0_2 = arith.constant 0 : index
    %2 = vector.load %arg2[%c0_1, %c0_2] : memref<32x256xbf16, #tpu.memory_space<vmem>>, vector<32x256xbf16>
    %cst = arith.constant dense<0.000000e+00> : vector<64x256xf32>
    %3 = tpu.matmul %1, %2, %cst {dimension_numbers = #tpu.dot_dimension_numbers<[1], [0], [0], [1], [0, 0, 1, 1], [], []>} : vector<64x32xbf16>, vector<32x256xbf16>, vector<64x256xf32> -> vector<64x256xf32>
    %c0_3 = arith.constant 0 : index
    %c0_4 = arith.constant 0 : index
    %4 = vector.load %arg3[%c0_3, %c0_4] : memref<1x256xf32, #tpu.memory_space<vmem>>, vector<1x256xf32>
    %5 = vector.broadcast %4 : vector<1x256xf32> to vector<64x256xf32>
    %6 = arith.addf %3, %5 : vector<64x256xf32>
    %cst_5 = arith.constant 0.000000e+00 : f32
    %7 = vector.broadcast %cst_5 : f32 to vector<64x256xf32>
    %8 = arith.maximumf %6, %7 : vector<64x256xf32>
    %9 = arith.truncf %8 : vector<64x256xf32> to vector<64x256xbf16>
    %c0_6 = arith.constant 0 : index
    %c0_7 = arith.constant 0 : index
    %10 = vector.load %arg4[%c0_6, %c0_7] : memref<256x128xbf16, #tpu.memory_space<vmem>>, vector<256x128xbf16>
    %cst_8 = arith.constant dense<0.000000e+00> : vector<64x128xf32>
    %11 = tpu.matmul %9, %10, %cst_8 {dimension_numbers = #tpu.dot_dimension_numbers<[1], [0], [0], [1], [0, 0, 1, 1], [], []>} : vector<64x256xbf16>, vector<256x128xbf16>, vector<64x128xf32> -> vector<64x128xf32>
    %c0_9 = arith.constant 0 : index
    %c0_10 = arith.constant 0 : index
    %12 = vector.load %arg5[%c0_9, %c0_10] : memref<1x128xf32, #tpu.memory_space<vmem>>, vector<1x128xf32>
    %13 = vector.broadcast %12 : vector<1x128xf32> to vector<64x128xf32>
    %14 = arith.addf %11, %13 : vector<64x128xf32>
    %cst_11 = arith.constant 0.000000e+00 : f32
    %15 = vector.broadcast %cst_11 : f32 to vector<64x128xf32>
    %16 = arith.maximumf %14, %15 : vector<64x128xf32>
    %17 = arith.truncf %16 : vector<64x128xf32> to vector<64x128xbf16>
    %c0_12 = arith.constant 0 : index
    %c0_13 = arith.constant 0 : index
    %18 = vector.load %arg6[%c0_12, %c0_13] : memref<128x64xbf16, #tpu.memory_space<vmem>>, vector<128x64xbf16>
    %cst_14 = arith.constant dense<0.000000e+00> : vector<64x64xf32>
    %19 = tpu.matmul %17, %18, %cst_14 {dimension_numbers = #tpu.dot_dimension_numbers<[1], [0], [0], [1], [0, 0, 1, 1], [], []>} : vector<64x128xbf16>, vector<128x64xbf16>, vector<64x64xf32> -> vector<64x64xf32>
    %c0_15 = arith.constant 0 : index
    %c0_16 = arith.constant 0 : index
    %20 = vector.load %arg7[%c0_15, %c0_16] : memref<1x64xf32, #tpu.memory_space<vmem>>, vector<1x64xf32>
    %21 = vector.broadcast %20 : vector<1x64xf32> to vector<64x64xf32>
    %22 = arith.addf %19, %21 : vector<64x64xf32>
    %cst_17 = arith.constant 0.000000e+00 : f32
    %23 = vector.broadcast %cst_17 : f32 to vector<64x64xf32>
    %24 = arith.maximumf %22, %23 : vector<64x64xf32>
    %25 = arith.truncf %24 : vector<64x64xf32> to vector<64x64xbf16>
    %c0_18 = arith.constant 0 : index
    %c0_19 = arith.constant 0 : index
    %26 = vector.load %arg8[%c0_18, %c0_19] : memref<64x8xbf16, #tpu.memory_space<vmem>>, vector<64x8xbf16>
    %cst_20 = arith.constant dense<0.000000e+00> : vector<64x8xf32>
    %27 = tpu.matmul %25, %26, %cst_20 {dimension_numbers = #tpu.dot_dimension_numbers<[1], [0], [0], [1], [0, 0, 1, 1], [], []>} : vector<64x64xbf16>, vector<64x8xbf16>, vector<64x8xf32> -> vector<64x8xf32>
    %c0_21 = arith.constant 0 : index
    %c0_22 = arith.constant 0 : index
    %28 = vector.load %arg9[%c0_21, %c0_22] : memref<1x8xf32, #tpu.memory_space<vmem>>, vector<1x8xf32>
    %29 = vector.broadcast %28 : vector<1x8xf32> to vector<64x8xf32>
    %30 = arith.addf %27, %29 : vector<64x8xf32>
    %c0_23 = arith.constant 0 : index
    %c0_24 = arith.constant 0 : index
    %31 = vector.load %arg10[%c0_23, %c0_24] : memref<64x8xf32, #tpu.memory_space<vmem>>, vector<64x8xf32>
    tpu.vector_store %arg10[%c0_23, %c0_24], %30 {strides = array<i32>} : memref<64x8xf32, #tpu.memory_space<vmem>>, vector<64x8xf32>,
    return
  }
  func.func @transform_0(%arg0: i32) -> (i32, i32) {
    %c0_i32 = arith.constant 0 : i32
    %c0_i32_0 = arith.constant 0 : i32
    return %arg0, %c0_i32 : i32, i32
  }
  func.func @transform_1(%arg0: i32) -> (i32, i32) {
    %c0_i32 = arith.constant 0 : i32
    %c0_i32_0 = arith.constant 0 : i32
    %c0_i32_1 = arith.constant 0 : i32
    return %c0_i32, %c0_i32_0 : i32, i32
  }
  func.func @transform_2(%arg0: i32) -> (i32, i32) {
    %c0_i32 = arith.constant 0 : i32
    %c0_i32_0 = arith.constant 0 : i32
    %c0_i32_1 = arith.constant 0 : i32
    return %c0_i32, %c0_i32_0 : i32, i32
  }
  func.func @transform_3(%arg0: i32) -> (i32, i32) {
    %c0_i32 = arith.constant 0 : i32
    %c0_i32_0 = arith.constant 0 : i32
    %c0_i32_1 = arith.constant 0 : i32
    return %c0_i32, %c0_i32_0 : i32, i32
  }
  func.func @transform_4(%arg0: i32) -> (i32, i32) {
    %c0_i32 = arith.constant 0 : i32
    %c0_i32_0 = arith.constant 0 : i32
    %c0_i32_1 = arith.constant 0 : i32
    return %c0_i32, %c0_i32_0 : i32, i32
  }
  func.func @transform_5(%arg0: i32) -> (i32, i32) {
    %c0_i32 = arith.constant 0 : i32
    %c0_i32_0 = arith.constant 0 : i32
    %c0_i32_1 = arith.constant 0 : i32
    return %c0_i32, %c0_i32_0 : i32, i32
  }
  func.func @transform_6(%arg0: i32) -> (i32, i32) {
    %c0_i32 = arith.constant 0 : i32
    %c0_i32_0 = arith.constant 0 : i32
    %c0_i32_1 = arith.constant 0 : i32
    return %c0_i32, %c0_i32_0 : i32, i32
  }
  func.func @transform_7(%arg0: i32) -> (i32, i32) {
    %c0_i32 = arith.constant 0 : i32
    %c0_i32_0 = arith.constant 0 : i32
    %c0_i32_1 = arith.constant 0 : i32
    return %c0_i32, %c0_i32_0 : i32, i32
  }
  func.func @transform_8(%arg0: i32) -> (i32, i32) {
    %c0_i32 = arith.constant 0 : i32
    %c0_i32_0 = arith.constant 0 : i32
    %c0_i32_1 = arith.constant 0 : i32
    return %c0_i32, %c0_i32_0 : i32, i32
  }
  func.func @transform_9(%arg0: i32) -> (i32, i32) {
    %c0_i32 = arith.constant 0 : i32
    %c0_i32_0 = arith.constant 0 : i32
    return %arg0, %c0_i32 : i32, i32
  }
}

</mosaic_0001>

<bundles_post_ra>
// kernel: tpu_custom_call.1
= control target key start
LH: loop header
LB: loop body
LE: loop exit
PB: predicated region body
PF: predicated region fallthrough
CT: control target
= control target key end

     0   :  { %s1293_s30 = smov 0   ;;  %s1451_s0 = inlined_call_operand.vmem [shape: f32[128,32], index: 0, kind: input, shape index: {}]   ;;  %s1452_s1 = inlined_call_operand.vmem [shape: bf16[32,256], index: 1, kind: input, shape index: {}]   ;;  %s1453_s2 = inlined_call_operand.vmem [shape: f32[1,256], index: 2, kind: input, shape index: {}]   ;;  %s1454_s3 = inlined_call_operand.vmem [shape: bf16[256,128], index: 3, kind: input, shape index: {}]   ;;  %s1455_s4 = inlined_call_operand.vmem [shape: f32[1,128], index: 4, kind: input, shape index: {}]   ;;  %s1456_s5 = inlined_call_operand.vmem [shape: bf16[128,64], index: 5, kind: input, shape index: {}]   ;;  %s1457_s6 = inlined_call_operand.vmem [shape: f32[1,64], index: 6, kind: input, shape index: {}]   ;;  %s1458_s7 = inlined_call_operand.vmem [shape: bf16[64,8], index: 7, kind: input, shape index: {}]   ;;  %s1459_s8 = inlined_call_operand.vmem [shape: f32[1,8], index: 8, kind: input, shape index: {}]   ;;  %s1460_s9 = inlined_call_operand.vmem [shape: f32[128,8], index: 9, kind: output, shape index: {}]  }
   0x1 LB: > { %s1037_s10 = sadd.s32 4294967295, %s1240_s30   ;;  %p1041_p0 = scmp.ge.s32.totalorder %s1240_s30, 1  ;;  %s1240_s30 = sphi %s1293_s30, %s19_s30  }
   0x2   : > { %p288_p1 = scmp.lt.s32.totalorder %s1240_s30, 3 }
   0x4   : > { %p289_p2 = pnand %p1041_p0, %p288_p1 }
   0x5   : > { %s1042_s13 = sshll.u32 (!%p289_p2), %s1037_s10, 3 }
   0x6   : > { %292 = sbr.rel (%p289_p2) target bundleno = 865 (0x361), region = 56  ;;  %p325_p3 = scmp.lt.s32.totalorder (!%p289_p2), %s1042_s13, 15 }
   0xb   : > { %v1200_v0 = vld [vmem:[%s1452_s1 + $0x14] ss:$8 sps:$4 sm:$0xff]   ;;  %v1202_v1 = vld [vmem:[%s1452_s1 + $0x10] ss:$8 sps:$4 sm:$0xff]   ;;  %v1242_v2 = vmov 0   ;;  %s1462_s13 = smov (!%p325_p3, %s1042_s13), 15  ;;  %v355_v36 = vlaneseq }
   0xc   : > { %430 = vmatprep.mubr.bf16.mxu0 %v1242_v2  ;;  %410 = vmatprep.subr.bf16.mxu0 %v1200_v0  ;;  %v1203_v3 = vld [vmem:[%s1452_s1 + $0x4] ss:$8 sps:$4 sm:$0xff]   ;;  %v1205_v4 = vld [vmem:[%s1452_s1] ss:$8 sps:$4 sm:$0xff]   ;;  %v1206_v5 = vld [vmem:[%s1454_s3 + $0x78] sm:$0xff]   ;;  %s1043_s24 = sshll.u32 %s1462_s13, 3 }
   0xd   : > { %411 = vmatpush1.bf16.msra.mxu0 %v1202_v1  ;;  %v1207_v6 = vld [vmem:[%s1454_s3 + $0x38] sm:$0xff]   ;;  %1091 = vmatprep.subr.bf16.mxu1 %v1206_v5  ;;  %v1208_v7 = vld [vmem:[%s1454_s3 + $0x70] sm:$0xff]   ;;  %s1330_s29 = scalar_lea.vmem %s1451_s0, %s1043_s24  ;;  %vm385_vm0 = vcmask 261120   ;;  %v1210_v14 = vld [vmem:[%s1454_s3 + $0x68] sm:$0xff]   ;;  %v356_v37 = vshrl.u32 %v355_v36, 7  ;;  %vm894_vm1 = vcmask 523264   ;;  %s334_s17 = scalar_lea.vmem %s1460_s9, %s1043_s24 }
   0xe   : > { %412 = vmatprep.subr.bf16.mxu0 %v1203_v3  ;;  %1092 = vmatpush3.bf16.msra.mxu1 %v1207_v6  ;;  %v1209_v8 = vld [vmem:[%s1454_s3 + $0x30] sm:$0xff]   ;;  %v337_v9 = vld [vmem:[%s1330_s29] sm:$0xff]  ;;  %v338_v10 = vld [vmem:[%s1330_s29 + $0x8] sm:$0xff]  ;;  %vm972_vm2 = vcmask 64512  }
   0xf   : > { %1093 = vmatprep.subr.bf16.mxu1 %v1208_v7  ;;  %v345_v11 = vpack.c.bf16 %v338_v10, %v337_v9  ;;  %v339_v12 = vld [vmem:[%s1330_s29 + $0x10] sm:$0xff]  ;;  %v340_v13 = vld [vmem:[%s1330_s29 + $0x18] sm:$0xff]  ;;  %v1211_v15 = vld [vmem:[%s1454_s3 + $0x28] sm:$0xff]   ;;  %v361_v38 = vsub.s32 1, %v356_v37  ;;  %v357_v39 = vsub.s32 0, %v356_v37 }
  0x10   : > { %v1212_v16 = vld [vmem:[%s1454_s3 + $0x60] sm:$0xff]   ;;  %v346_v17 = vpack.c.bf16 %v340_v13, %v339_v12  ;;  %v1214_v19 = vld [vmem:[%s1454_s3 + $0x58] sm:$0xff]   ;;  %v342_v22 = vld [vmem:[%s1330_s29 + $0x28] sm:$0xff] }
  0x11   : > { %413 = vmatpush1.bf16.msra.mxu0 %v1205_v4  ;;  %v1213_v18 = vld [vmem:[%s1454_s3 + $0x20] sm:$0xff]   ;;  %v1215_v20 = vld [vmem:[%s1454_s3 + $0x18] sm:$0xff]   ;;  %v343_v24 = vld [vmem:[%s1330_s29 + $0x30] sm:$0xff] }
  0x12   : > { %1094 = vmatpush3.bf16.msra.mxu1 %v1209_v8  ;;  %v341_v21 = vld [vmem:[%s1330_s29 + $0x20] sm:$0xff]  ;;  %v344_v25 = vld [vmem:[%s1330_s29 + $0x38] sm:$0xff]  ;;  %v1216_v27 = vld [vmem:[%s1454_s3 + $0x50] sm:$0xff]  }
  0x13   : > { %1095 = vmatprep.subr.bf16.mxu1 %v1210_v14  ;;  %v347_v23 = vpack.c.bf16 %v342_v22, %v341_v21  ;;  %v348_v26 = vpack.c.bf16 %v344_v25, %v343_v24  ;;  %v1217_v28 = vld [vmem:[%s1454_s3 + $0x10] sm:$0xff]   ;;  %v1218_v29 = vld [vmem:[%s1454_s3 + $0x48] sm:$0xff]   ;;  %v1220_v31 = vld [vmem:[%s1454_s3 + $0x40] sm:$0xff]  }
  0x14   : > { %1050 = vmatmul.mubr.msk.bf16.vlgmr.msra.gmra.mxu0 %vm385_vm0, %v345_v11  ;;  %v1219_v30 = vld [vmem:[%s1454_s3 + $0x8] sm:$0xff]   ;;  %v1221_v32 = vld [vmem:[%s1454_s3] sm:$0xff]   ;;  %v1222_v33 = vld [vmem:[%s1456_s5 + $0x38] sm:$0xff]  }
  0x15   : > { %440 = vmatprep.mubr.bf16.mxu0 %v1242_v2  ;;  %v1223_v34 = vld [vmem:[%s1456_s5 + $0x30] sm:$0xff]   ;;  %1151 = vmatprep.subr.bf16.mxu0 %v1222_v33  ;;  %v1224_v35 = vld [vmem:[%s1456_s5 + $0x28] sm:$0xff]   ;;  %v353_v40 = vld [vmem:[%s1453_s2] sm:$0x3] }
  0x16   : > { %1096 = vmatpush3.bf16.msra.mxu1 %v1211_v15  ;;  %1152 = vmatpush3.bf16.msra.mxu0 %v1222_v33  ;;  %v362_v42 = vrot.slane %v353_v40, %v361_v38  ;;  %v358_v43 = vrot.slane %v353_v40, %v357_v39  ;;  %v1226_v36 = vld [vmem:[%s1456_s5 + $0x18] sm:$0xff]   ;;  %v1227_v37 = vld [vmem:[%s1456_s5 + $0x10] sm:$0xff]   ;;  %v1228_v38 = vld [vmem:[%s1456_s5 + $0x8] sm:$0xff]  }
  0x17   : > { %1097 = vmatprep.subr.bf16.mxu1 %v1212_v16  ;;  %1153 = vmatprep.subr.bf16.mxu0 %v1223_v34  ;;  %v1229_v39 = vld [vmem:[%s1456_s5] sm:$0xff]   ;;  %v1230_v40 = vld [vmem:[%s1458_s7 + $0x18] sm:$0xff]  }
  0x1a   : > { %1098 = vmatpush3.bf16.msra.mxu1 %v1213_v18  ;;  %1154 = vmatpush3.bf16.msra.mxu0 %v1223_v34 }
  0x1b   : > { %1099 = vmatprep.subr.bf16.mxu1 %v1214_v19  ;;  %1155 = vmatprep.subr.bf16.mxu0 %v1224_v35 }
  0x1c   : > { %1051 = vmatmul.mubr.msk.bf16.gmra.mxu0 %vm385_vm0, %v346_v17 }
  0x1d   : > { %450 = vmatprep.mubr.bf16.mxu0 %v1242_v2 }
  0x1e   : > { %1100 = vmatpush3.bf16.msra.mxu1 %v1215_v20  ;;  %1156 = vmatpush3.bf16.msra.mxu0 %v1224_v35  ;;  %v1225_v35 = vld [vmem:[%s1456_s5 + $0x20] sm:$0xff]  }
  0x1f   : > { %1101 = vmatprep.subr.bf16.mxu1 %v1216_v27  ;;  %1157 = vmatprep.subr.bf16.mxu0 %v1225_v35 }
  0x22   : > { %1102 = vmatpush3.bf16.msra.mxu1 %v1217_v28  ;;  %1158 = vmatpush3.bf16.msra.mxu0 %v1225_v35 }
  0x23   : > { %1103 = vmatprep.subr.bf16.mxu1 %v1218_v29  ;;  %1159 = vmatprep.subr.bf16.mxu0 %v1226_v36 }
  0x24   : > { %1052 = vmatmul.mubr.msk.bf16.gmra.mxu0 %vm385_vm0, %v347_v23 }
  0x25   : > { %460 = vmatprep.mubr.bf16.mxu0 %v1242_v2 }
  0x26   : > { %1104 = vmatpush3.bf16.msra.mxu1 %v1219_v30  ;;  %1160 = vmatpush3.bf16.msra.mxu0 %v1226_v36 }
  0x27   : > { %1105 = vmatprep.subr.bf16.mxu1 %v1220_v31  ;;  %1161 = vmatprep.subr.bf16.mxu0 %v1227_v37 }
  0x2a   : > { %1106 = vmatpush3.bf16.msra.mxu1 %v1221_v32  ;;  %1162 = vmatpush3.bf16.msra.mxu0 %v1227_v37 }
  0x2b   : > { %1163 = vmatprep.subr.bf16.mxu0 %v1228_v38 }
  0x2c   : > { %1053 = vmatmul.mubr.msk.bf16.gmra.mxu0 %vm385_vm0, %v348_v26 }
  0x2e   : > { %1164 = vmatpush3.bf16.msra.mxu0 %v1228_v38 }
  0x2f   : > { %1165 = vmatprep.subr.bf16.mxu0 %v1229_v39 }
  0x32   : > { %1166 = vmatpush3.bf16.msra.mxu0 %v1229_v39 }
  0x33   : > { %1175 = vmatprep.subr.bf16.mxu0 %v1230_v40 }
  0xd4   : > { %v432_v41 = vpop.f32.mrf.mxu0 }
  0xd5   : > { %v433_v48 = vadd.f32 %v432_v41, %v358_v43 }
  0xd6   : > { %v434_v44 = vpop.f32.mrf.mxu0 }
  0xd7   : > { %v435_v46 = vadd.f32 %v434_v44, %v362_v42  ;;  %v471_v55 = vmax.f32 %v433_v48, 0.0  ;;  %v1054_v44 = vld [vmem:[%s1455_s4] ss:$0 sm:$0xff] }
  0xd8   : > { %v436_v45 = vpop.f32.mrf.mxu0 }
  0xd9   : > { %v437_v47 = vadd.f32 %v436_v45, %v358_v43  ;;  %v472_v53 = vmax.f32 %v435_v46, 0.0 }
  0xda   : > { %v438_v49 = vpop.f32.mrf.mxu0 }
  0xdb   : > { %v439_v50 = vadd.f32 %v438_v49, %v362_v42  ;;  %v473_v51 = vmax.f32 %v437_v47, 0.0 }
  0xdc   : > { %v442_v52 = vpop.f32.mrf.mxu0 }
  0xdd   : > { %v474_v54 = vmax.f32 %v439_v50, 0.0  ;;  %v487_v58 = vpack.c.bf16 %v473_v51, %v471_v55  ;;  %v443_v62 = vadd.f32 %v442_v52, %v358_v43 }
  0xde   : > { %v444_v56 = vpop.f32.mrf.mxu0 }
  0xdf   : > { %v488_v57 = vpack.c.bf16 %v474_v54, %v472_v53  ;;  %v445_v60 = vadd.f32 %v444_v56, %v362_v42  ;;  %v475_v5 = vmax.f32 %v443_v62, 0.0 }
  0xe0   : > { %v446_v59 = vpop.f32.mrf.mxu0 }
  0xe1   : > { %v447_v61 = vadd.f32 %v446_v59, %v358_v43  ;;  %662 = vmatprep.mubr.bf16.mxu1 %v488_v57  ;;  %v476_v3 = vmax.f32 %v445_v60, 0.0 }
  0xe2   : > { %v448_v63 = vpop.f32.mrf.mxu0  ;;  %663 = vmatmul.mubr.bf16.vlgmr.msra.gmra.mxu1 %v487_v58 }
  0xe3   : > { %v449_v0 = vadd.f32 %v448_v63, %v362_v42  ;;  %v477_v1 = vmax.f32 %v447_v61, 0.0 }
  0xe4   : > { %v452_v2 = vpop.f32.mrf.mxu0 }
  0xe5   : > { %v478_v4 = vmax.f32 %v449_v0, 0.0  ;;  %v489_v8 = vpack.c.bf16 %v477_v1, %v475_v5  ;;  %v453_v12 = vadd.f32 %v452_v2, %v358_v43 }
  0xe6   : > { %v454_v6 = vpop.f32.mrf.mxu0 }
  0xe7   : > { %v490_v7 = vpack.c.bf16 %v478_v4, %v476_v3  ;;  %v455_v10 = vadd.f32 %v454_v6, %v362_v42  ;;  %v479_v19 = vmax.f32 %v453_v12, 0.0 }
  0xe8   : > { %v456_v9 = vpop.f32.mrf.mxu0 }
  0xe9   : > { %v457_v11 = vadd.f32 %v456_v9, %v358_v43  ;;  %670 = vmatprep.mubr.bf16.mxu1 %v490_v7  ;;  %v480_v17 = vmax.f32 %v455_v10, 0.0 }
  0xea   : > { %v458_v13 = vpop.f32.mrf.mxu0  ;;  %671 = vmatmul.mubr.bf16.gmra.mxu1 %v489_v8 }
  0xeb   : > { %v459_v14 = vadd.f32 %v458_v13, %v362_v42  ;;  %v481_v15 = vmax.f32 %v457_v11, 0.0 }
  0xec   : > { %v462_v16 = vpop.f32.mrf.mxu0 }
  0xed   : > { %v482_v18 = vmax.f32 %v459_v14, 0.0  ;;  %v491_v22 = vpack.c.bf16 %v481_v15, %v479_v19  ;;  %v463_v26 = vadd.f32 %v462_v16, %v358_v43 }
  0xee   : > { %v464_v20 = vpop.f32.mrf.mxu0 }
  0xef   : > { %v492_v21 = vpack.c.bf16 %v482_v18, %v480_v17  ;;  %v465_v24 = vadd.f32 %v464_v20, %v362_v42  ;;  %v483_v32 = vmax.f32 %v463_v26, 0.0 }
  0xf0   : > { %v466_v23 = vpop.f32.mrf.mxu0 }
  0xf1   : > { %v467_v25 = vadd.f32 %v466_v23, %v358_v43  ;;  %678 = vmatprep.mubr.bf16.mxu1 %v492_v21  ;;  %v484_v30 = vmax.f32 %v465_v24, 0.0  ;;  %v1232_v23 = vld [vmem:[%s1458_s7 + $0x8] sm:$0xff]   ;;  %v1233_v24 = vld [vmem:[%s1458_s7] sm:$0xff]  }
  0xf2   : > { %v468_v27 = vpop.f32.mrf.mxu0  ;;  %679 = vmatmul.mubr.bf16.gmra.mxu1 %v491_v22  ;;  %v1231_v22 = vld [vmem:[%s1458_s7 + $0x10] sm:$0xff]  }
  0xf3   : > { %v469_v28 = vadd.f32 %v468_v27, %v362_v42  ;;  %v485_v29 = vmax.f32 %v467_v25, 0.0  ;;  %v1071_v27 = vld [vmem:[%s1457_s6] ss:$0 sm:$0xff] }
  0xf5   : > { %v486_v31 = vmax.f32 %v469_v28, 0.0  ;;  %v493_v34 = vpack.c.bf16 %v485_v29, %v483_v32 }
  0xf7   : > { %v494_v33 = vpack.c.bf16 %v486_v31, %v484_v30 }
  0xf9   : > { %686 = vmatprep.mubr.bf16.mxu1 %v494_v33 }
  0xfa   : > { %687 = vmatmul.mubr.bf16.gmra.mxu1 %v493_v34 }
 0x1a2   : > { %v1107_v41 = vpop.f32.mrf.mxu1 }
 0x1a4   : > { %v1108_v42 = vpop.f32.mrf.mxu1 }
 0x1a5   : > { %v1109_v43 = vadd.f32 %v1108_v42, %v1107_v41 }
 0x1a6   : > { %v1110_v45 = vpop.f32.mrf.mxu1 }
 0x1a7   : > { %v665_v47 = vadd.f32 %v1109_v43, %v1054_v44 }
 0x1a8   : > { %v1111_v46 = vpop.f32.mrf.mxu1 }
 0x1a9   : > { %v1112_v48 = vadd.f32 %v1111_v46, %v1110_v45  ;;  %v695_v52 = vmax.f32 %v665_v47, 0.0 }
 0x1aa   : > { %v1113_v49 = vpop.f32.mrf.mxu1 }
 0x1ab   : > { %v668_v50 = vadd.f32 %v1112_v48, %v1054_v44 }
 0x1ac   : > { %v1114_v51 = vpop.f32.mrf.mxu1 }
 0x1ad   : > { %v696_v53 = vmax.f32 %v668_v50, 0.0  ;;  %v1115_v54 = vadd.f32 %v1114_v51, %v1113_v49 }
 0x1ae   : > { %v1116_v55 = vpop.f32.mrf.mxu1 }
 0x1af   : > { %v703_v56 = vpack.c.bf16 %v696_v53, %v695_v52  ;;  %v673_v58 = vadd.f32 %v1115_v54, %v1054_v44  ;;  %v1080_v54 = vld [vmem:[%s1459_s8] ss:$0 sm:$0xff] }
 0x1b0   : > { %v1117_v57 = vpop.f32.mrf.mxu1 }
 0x1b1   : > { %v1118_v59 = vadd.f32 %v1117_v57, %v1116_v55  ;;  %1167 = vmatprep.mubr.bf16.mxu0 %v703_v56  ;;  %v697_v63 = vmax.f32 %v673_v58, 0.0 }
 0x1b2   : > { %v1119_v60 = vpop.f32.mrf.mxu1 }
 0x1b3   : > { %v676_v61 = vadd.f32 %v1118_v59, %v1054_v44 }
 0x1b4   : > { %v1120_v62 = vpop.f32.mrf.mxu1 }
 0x1b5   : > { %v698_v0 = vmax.f32 %v676_v61, 0.0  ;;  %v1121_v1 = vadd.f32 %v1120_v62, %v1119_v60 }
 0x1b6   : > { %v1122_v2 = vpop.f32.mrf.mxu1 }
 0x1b7   : > { %v704_v3 = vpack.c.bf16 %v698_v0, %v697_v63  ;;  %v681_v5 = vadd.f32 %v1121_v1, %v1054_v44 }
 0x1b8   : > { %v1123_v4 = vpop.f32.mrf.mxu1 }
 0x1b9   : > { %v1124_v6 = vadd.f32 %v1123_v4, %v1122_v2  ;;  %1168 = vmatmul.mubr.bf16.vlgmr.msra.gmra.mxu0 %v704_v3  ;;  %v699_v10 = vmax.f32 %v681_v5, 0.0 }
 0x1ba   : > { %v1125_v7 = vpop.f32.mrf.mxu1  ;;  %1176 = vmatpush3.bf16.msra.mxu0 %v1230_v40 }
 0x1bb   : > { %v684_v8 = vadd.f32 %v1124_v6, %v1054_v44  ;;  %1177 = vmatprep.subr.bf16.mxu0 %v1231_v22 }
 0x1bc   : > { %v1126_v9 = vpop.f32.mrf.mxu1 }
 0x1bd   : > { %v700_v11 = vmax.f32 %v684_v8, 0.0  ;;  %v1127_v12 = vadd.f32 %v1126_v9, %v1125_v7 }
 0x1be   : > { %v1128_v13 = vpop.f32.mrf.mxu1  ;;  %1178 = vmatpush3.bf16.msra.mxu0 %v1231_v22 }
 0x1bf   : > { %v705_v14 = vpack.c.bf16 %v700_v11, %v699_v10  ;;  %v689_v16 = vadd.f32 %v1127_v12, %v1054_v44  ;;  %1179 = vmatprep.subr.bf16.mxu0 %v1232_v23 }
 0x1c0   : > { %v1129_v15 = vpop.f32.mrf.mxu1 }
 0x1c1   : > { %v1130_v17 = vadd.f32 %v1129_v15, %v1128_v13  ;;  %1171 = vmatprep.mubr.bf16.mxu0 %v705_v14  ;;  %v701_v19 = vmax.f32 %v689_v16, 0.0 }
 0x1c2   : > { %1180 = vmatpush3.bf16.msra.mxu0 %v1232_v23 }
 0x1c3   : > { %v692_v18 = vadd.f32 %v1130_v17, %v1054_v44  ;;  %1181 = vmatprep.subr.bf16.mxu0 %v1233_v24 }
 0x1c5   : > { %v702_v20 = vmax.f32 %v692_v18, 0.0 }
 0x1c6   : > { %1182 = vmatpush3.bf16.msra.mxu0 %v1233_v24 }
 0x1c7   : > { %v706_v21 = vpack.c.bf16 %v702_v20, %v701_v19 }
 0x1c9   : > { %1172 = vmatmul.mubr.bf16.gmra.mxu0 %v706_v21 }
 0x279   : > { %v1169_v25 = vpop.f32.mrf.mxu0 }
 0x27a   : > { %v821_v31 = vadd.f32 %v1169_v25, %v1071_v27 }
 0x27b   : > { %v812_v26 = vpop.f32.mrf.mxu0 }
 0x27c   : > { %v813_v29 = vadd.f32 %v1071_v27, %v812_v26  ;;  %v845_v37 = vmax.f32 %v821_v31, 0.0 }
 0x27d   : > { %v1170_v28 = vpop.f32.mrf.mxu0 }
 0x27e   : > { %v824_v30 = vadd.f32 %v1170_v28, %v1071_v27  ;;  %v843_v35 = vmax.f32 %v813_v29, 0.0 }
 0x27f   : > { %v815_v32 = vpop.f32.mrf.mxu0 }
 0x280   : > { %v816_v33 = vadd.f32 %v1071_v27, %v815_v32  ;;  %v846_v34 = vmax.f32 %v824_v30, 0.0 }
 0x282   : > { %v844_v36 = vmax.f32 %v816_v33, 0.0  ;;  %v852_v39 = vpack.c.bf16 %v846_v34, %v845_v37 }
 0x284   : > { %v851_v38 = vpack.c.bf16 %v844_v36, %v843_v35 }
 0x286   : > { %1183 = vmatprep.mubr.msk.bf16.mxu0 %vm894_vm1, %v851_v38 }
 0x287   : > { %1184 = vmatmul.mubr.msk.bf16.vlgmr.msra.gmra.mxu0 %vm894_vm1, %v852_v39 }
 0x289   : > { %v1173_v40 = vpop.f32.mrf.mxu0 }
 0x28a   : > { %v837_v45 = vadd.f32 %v1173_v40, %v1071_v27 }
 0x28b   : > { %v828_v41 = vpop.f32.mrf.mxu0 }
 0x28c   : > { %v829_v43 = vadd.f32 %v1071_v27, %v828_v41  ;;  %v849_v51 = vmax.f32 %v837_v45, 0.0 }
 0x28d   : > { %v1174_v42 = vpop.f32.mrf.mxu0 }
 0x28e   : > { %v840_v44 = vadd.f32 %v1174_v42, %v1071_v27  ;;  %v847_v49 = vmax.f32 %v829_v43, 0.0 }
 0x28f   : > { %v831_v46 = vpop.f32.mrf.mxu0 }
 0x290   : > { %v832_v47 = vadd.f32 %v1071_v27, %v831_v46  ;;  %v850_v48 = vmax.f32 %v840_v44, 0.0 }
 0x292   : > { %v848_v50 = vmax.f32 %v832_v47, 0.0  ;;  %v854_v53 = vpack.c.bf16 %v850_v48, %v849_v51 }
 0x294   : > { %v853_v52 = vpack.c.bf16 %v848_v50, %v847_v49 }
 0x296   : > { %1187 = vmatprep.mubr.msk.bf16.mxu0 %vm894_vm1, %v853_v52 }
 0x297   : > { %1188 = vmatmul.mubr.msk.bf16.gmra.mxu0 %vm894_vm1, %v854_v53 }
 0x347   : > { %v1185_v55 = vpop.f32.mrf.mxu0 }
 0x348   : > { %v950_v56 = vadd.f32 %v1185_v55, %v1080_v54 }
 0x349   : > { %v941_v57 = vpop.f32.mrf.mxu0 }
 0x34a   : > { %975 = vst.msk [vmem:[%s334_s17 + $0x10] sm:$0xff] %vm972_vm2, %v950_v56  ;;  %v942_v58 = vadd.f32 %v1080_v54, %v941_v57 }
 0x34b   : > { %v1186_v59 = vpop.f32.mrf.mxu0 }
 0x34c   : > { %973 = vst.msk [vmem:[%s334_s17] sm:$0xff] %vm972_vm2, %v942_v58  ;;  %v953_v60 = vadd.f32 %v1186_v59, %v1080_v54 }
 0x34d   : > { %v944_v61 = vpop.f32.mrf.mxu0 }
 0x34e   : > { %976 = vst.msk [vmem:[%s334_s17 + $0x18] sm:$0xff] %vm972_vm2, %v953_v60  ;;  %v945_v62 = vadd.f32 %v1080_v54, %v944_v61 }
 0x350   : > { %974 = vst.msk [vmem:[%s334_s17 + $0x8] sm:$0xff] %vm972_vm2, %v945_v62 }
 0x357   : > { %v1189_v63 = vpop.f32.mrf.mxu0 }
 0x358   : > { %v966_v0 = vadd.f32 %v1189_v63, %v1080_v54 }
 0x359   : > { %v957_v1 = vpop.f32.mrf.mxu0 }
 0x35a   : > { %979 = vst.msk [vmem:[%s334_s17 + $0x30] sm:$0xff] %vm972_vm2, %v966_v0  ;;  %v958_v2 = vadd.f32 %v1080_v54, %v957_v1 }
 0x35b   : > { %v1190_v3 = vpop.f32.mrf.mxu0 }
 0x35c   : > { %977 = vst.msk [vmem:[%s334_s17 + $0x20] sm:$0xff] %vm972_vm2, %v958_v2  ;;  %v969_v4 = vadd.f32 %v1190_v3, %v1080_v54 }
 0x35d   : > { %v960_v5 = vpop.f32.mrf.mxu0 }
 0x35e   : > { %980 = vst.msk [vmem:[%s334_s17 + $0x38] sm:$0xff] %vm972_vm2, %v969_v4  ;;  %v961_v6 = vadd.f32 %v1080_v54, %v960_v5 }
 0x360   : > { %978 = vst.msk [vmem:[%s334_s17 + $0x28] sm:$0xff] %vm972_vm2, %v961_v6 }
 0x361 PF: > { %s19_s30 = sadd.s32 1, %s1240_s30  }
 0x362   : > { %p16_p4 = scmp.ge.s32.totalorder %s19_s30, 4  }
 0x364   :  { %18 = sbr.rel (!%p16_p4) target bundleno = 1 (0x1), region = 86 }

</bundles_post_ra>
